<compile_context>
chip_gen: v5e
topology: v5e:2x2
jax: 0.10.0
libtpu: 0.0.40
codegen_flags: <defaults>
</compile_context>

<pallas_src>
import functools

import jax
import jax.numpy as jnp
from jax.experimental import pallas as pl
from jax.experimental.pallas import tpu as pltpu

_LANE = 128


def _vmem_capacity_bytes():
    """Physical VMEM per core; conservative 64 MiB (v7x) fallback."""
    try:
        cap = int(pltpu.get_tpu_info().vmem_capacity_bytes)
        if cap > 0:
            return cap
    except Exception:
        pass
    return 64 << 20


# ---------------------------------------------------------------------------
# Fast path: whole (C, H*W) slab per batch element resident in VMEM.
# ---------------------------------------------------------------------------


def _channel_attention_kernel(x_ref, w1t_ref, w2t_ref, o_ref, *, true_hw):
    """One grid step: Bb batch elements, all channels, full spatial extent.

    x_ref  : (Bb, C, HW)  input block (native dtype, lane-dense last axis)
    w1t_ref: (C, Ch)      transposed 1x1-conv #1 weight
    w2t_ref: (Ch, C)      transposed 1x1-conv #2 weight
    o_ref  : (Bb, C, HW)
    """
    bb = x_ref.shape[0]
    x = x_ref[...]                                            # native dtype

    # Global pools straight off the native-dtype tile: f32 accumulation for
    # the mean, max in native dtype then widened.  No full-block f32 copy.
    avg = jnp.sum(x, axis=-1, dtype=jnp.float32) * (1.0 / float(true_hw))
    mx = jnp.max(x, axis=-1).astype(jnp.float32)              # (Bb, C)

    # Shared MLP fused: one matmul pair covers avg+max of all Bb elements.
    pooled = jnp.concatenate([avg, mx], axis=0)               # (2*Bb, C)
    w1t = w1t_ref[...].astype(jnp.float32)                    # (C, Ch)
    w2t = w2t_ref[...].astype(jnp.float32)                    # (Ch, C)
    h = jnp.maximum(
        jnp.dot(pooled, w1t, preferred_element_type=jnp.float32), 0.0)
    mlp = jnp.dot(h, w2t, preferred_element_type=jnp.float32)  # (2*Bb, C)

    att = jax.nn.sigmoid(mlp[:bb] + mlp[bb:])                 # (Bb, C) f32
    # Sublane-broadcast multiply in the input dtype (native bf16 VPU on
    # v6e/v7x); no full-block broadcast temp.
    o_ref[...] = (x * att.astype(x.dtype)[:, :, None]).astype(o_ref.dtype)


def _choose_batch_block(B, slab_bytes, block_budget):
    """Pick Bb (a divisor of B) for the single-pass path.

    Preference order: (a) enough grid depth (>=8 steps, i.e. >=4 per core on
    v7x) so the first/last DMAs are hidden, (b) an even step count (TC load
    balance on v7x), (c) blocks of a few MiB so the ~0.35us per-step overhead
    stays negligible, (d) otherwise the largest block that fits the budget.
    """
    bb_cap = max(1, min(B, block_budget // max(4 * slab_bytes, 1)))
    candidates = [d for d in range(1, bb_cap + 1) if B % d == 0] or [1]
    target_steps = min(B, 8)

    def score(d):
        steps = B // d
        deep_enough = steps >= target_steps
        even_steps = (steps % 2 == 0) or steps == 1
        big_enough = (d * slab_bytes >= (2 << 20)) or d == bb_cap
        return (deep_enough, even_steps, big_enough, d)

    return max(candidates, key=score)


def _channel_attention_single_pass(x_flat, w1, w2, itemsize, block_budget,
                                   vmem_limit_cap):
    B, C, HW = x_flat.shape
    Ch = w1.shape[0]
    slab = C * HW * itemsize
    Bb = _choose_batch_block(B, slab, block_budget)
    grid = (B // Bb,)

    # Pre-transposed weights -> no in-kernel transpose.
    w1t = jnp.transpose(w1)                                   # (C, Ch)
    w2t = jnp.transpose(w2)                                   # (Ch, C)

    weight_bytes = 2 * C * Ch * jnp.dtype(w1.dtype).itemsize
    vmem_needed = 4 * Bb * slab + 4 * weight_bytes + (2 << 20)
    vmem_limit = int(min(max(vmem_needed, 32 << 20), vmem_limit_cap))

    cost = pl.CostEstimate(
        flops=2 * B * C * HW + 8 * B * C * Ch,
        transcendentals=2 * B * C,
        bytes_accessed=2 * B * C * HW * itemsize + weight_bytes,
    )

    kernel = functools.partial(_channel_attention_kernel, true_hw=HW)
    return pl.pallas_call(
        kernel,
        out_shape=jax.ShapeDtypeStruct((B, C, HW), x_flat.dtype),
        grid_spec=pltpu.PrefetchScalarGridSpec(
            num_scalar_prefetch=0,
            grid=grid,
            in_specs=[
                pl.BlockSpec((Bb, C, HW), lambda b: (b, 0, 0)),
                pl.BlockSpec((C, Ch), lambda b: (0, 0)),
                pl.BlockSpec((Ch, C), lambda b: (0, 0)),
            ],
            out_specs=pl.BlockSpec((Bb, C, HW), lambda b: (b, 0, 0)),
        ),
        compiler_params=pltpu.CompilerParams(
            dimension_semantics=("parallel",),
            vmem_limit_bytes=vmem_limit,
        ),
        cost_estimate=cost,
    )(x_flat, w1t, w2t)


# ---------------------------------------------------------------------------
# Fallback path: spatially tiled two-pass (pool -> tiny MLP -> apply).
# ---------------------------------------------------------------------------


def _pool_kernel(x_ref, sum_ref, max_ref, *, true_hw, tile_hw):
    """Accumulate per-channel sum/max over a spatial 'arbitrary' grid axis.

    x_ref  : (1, C, tile_hw)  spatial tile (native dtype)
    sum_ref: (1, 1, C) f32    resident across the spatial axis
    max_ref: (1, 1, C) f32    resident across the spatial axis
    """
    s = pl.program_id(1)

    @pl.when(s == 0)
    def _():
        sum_ref[...] = jnp.zeros_like(sum_ref)
        max_ref[...] = jnp.full_like(max_ref, -jnp.inf)

    x = x_ref[...]
    if true_hw % tile_hw != 0:
        # Tail tile only logically; mask built as a (1,1,tile_hw) lane iota
        # (single-row), not a full-block iota.
        lane = jax.lax.broadcasted_iota(jnp.int32, (1, 1, tile_hw), 2)
        valid = (s * tile_hw + lane) < true_hw
        x_sum = jnp.where(valid, x, jnp.zeros_like(x))
        x_max = jnp.where(valid, x, jnp.full_like(x, -jnp.inf))
    else:
        x_sum = x
        x_max = x

    sum_ref[...] += jnp.sum(x_sum, axis=-1, dtype=jnp.float32)[:, None, :]
    max_ref[...] = jnp.maximum(
        max_ref[...], jnp.max(x_max, axis=-1).astype(jnp.float32)[:, None, :])


def _apply_kernel(x_ref, att_ref, o_ref):
    """o = x * att, lane-broadcast of the per-channel attention.

    x_ref  : (1, C, tile_hw)
    att_ref: (1, C, 1)  (input dtype)
    """
    o_ref[...] = (x_ref[...] * att_ref[...]).astype(o_ref.dtype)


def _channel_attention_two_pass(x_flat, w1, w2, itemsize, block_budget,
                                vmem_limit_cap):
    B, C, HW = x_flat.shape

    # Lane-dense spatial tile (multiple of 128) so the apply pass's in+out,
    # double-buffered blocks fit the budget with Bb = 1.
    lanes_cap = max(1, block_budget // max(4 * C * itemsize, 1))
    tile_hw = max(_LANE, (lanes_cap // _LANE) * _LANE)
    tile_hw = min(tile_hw, pl.cdiv(HW, _LANE) * _LANE)
    grid_s = pl.cdiv(HW, tile_hw)
    grid = (B, grid_s)

    tile_bytes = C * tile_hw * itemsize
    vmem_limit = int(min(max(4 * tile_bytes + (4 << 20), 32 << 20),
                         vmem_limit_cap))

    pool_cost = pl.CostEstimate(
        flops=2 * B * C * HW,
        transcendentals=0,
        bytes_accessed=B * C * HW * itemsize + 8 * B * C,
    )
    pooled_sum, pooled_max = pl.pallas_call(
        functools.partial(_pool_kernel, true_hw=HW, tile_hw=tile_hw),
        out_shape=(jax.ShapeDtypeStruct((B, 1, C), jnp.float32),
                   jax.ShapeDtypeStruct((B, 1, C), jnp.float32)),
        grid_spec=pltpu.PrefetchScalarGridSpec(
            num_scalar_prefetch=0,
            grid=grid,
            in_specs=[pl.BlockSpec((1, C, tile_hw), lambda b, s: (b, 0, s))],
            out_specs=[pl.BlockSpec((1, 1, C), lambda b, s: (b, 0, 0)),
                       pl.BlockSpec((1, 1, C), lambda b, s: (b, 0, 0))],
        ),
        compiler_params=pltpu.CompilerParams(
            dimension_semantics=("parallel", "arbitrary"),
            vmem_limit_bytes=vmem_limit,
        ),
        cost_estimate=pool_cost,
    )(x_flat)

    # Shared MLP on (B, C) pooled vectors is tiny -> plain JAX between passes.
    avg = pooled_sum[:, 0, :] * (1.0 / float(HW))
    mx = pooled_max[:, 0, :]
    w1f = w1.astype(jnp.float32)
    w2f = w2.astype(jnp.float32)

    def mlp(v):
        return jnp.maximum(v @ w1f.T, 0.0) @ w2f.T

    att = jax.nn.sigmoid(mlp(avg) + mlp(mx)).astype(x_flat.dtype)  # (B, C)
    att3 = att[:, :, None]                                         # (B, C, 1)

    apply_cost = pl.CostEstimate(
        flops=B * C * HW,
        transcendentals=0,
        bytes_accessed=2 * B * C * HW * itemsize,
    )
    return pl.pallas_call(
        _apply_kernel,
        out_shape=jax.ShapeDtypeStruct((B, C, HW), x_flat.dtype),
        grid_spec=pltpu.PrefetchScalarGridSpec(
            num_scalar_prefetch=0,
            grid=grid,
            in_specs=[pl.BlockSpec((1, C, tile_hw), lambda b, s: (b, 0, s)),
                      pl.BlockSpec((1, C, 1), lambda b, s: (b, 0, 0))],
            out_specs=pl.BlockSpec((1, C, tile_hw), lambda b, s: (b, 0, s)),
        ),
        compiler_params=pltpu.CompilerParams(
            dimension_semantics=("parallel", "parallel"),
            vmem_limit_bytes=vmem_limit,
        ),
        cost_estimate=apply_cost,
    )(x_flat, att3)


# ---------------------------------------------------------------------------
# Public wrapper
# ---------------------------------------------------------------------------


def channel_attention(x, w1, w2, *, block_budget_bytes=None):
    """CBAM channel attention forward.

    x : (B, C, H, W)   input feature map
    w1: (C//r, C)      first 1x1 conv weight (out, in), bias-free
    w2: (C, C//r)      second 1x1 conv weight (out, in), bias-free
    """
    B, C, H, W = x.shape
    HW = H * W
    itemsize = jnp.dtype(x.dtype).itemsize

    vmem_cap = _vmem_capacity_bytes()
    vmem_limit_cap = int(0.85 * vmem_cap)          # never exceed physical VMEM
    if block_budget_bytes is None:
        # Headroom for weights, small temporaries and compiler scratch.
        block_budget_bytes = int(0.6 * vmem_limit_cap)

    x_flat = x.reshape(B, C, HW)                   # lane-dense, no padding
    slab = C * HW * itemsize                       # one batch element, 1 buffer

    if 4 * slab <= block_budget_bytes:
        out_flat = _channel_attention_single_pass(
            x_flat, w1, w2, itemsize, block_budget_bytes, vmem_limit_cap)
    else:
        out_flat = _channel_attention_two_pass(
            x_flat, w1, w2, itemsize, block_budget_bytes, vmem_limit_cap)

    return out_flat.reshape(B, C, H, W)


def reference(x, w1, w2):
    """Pure-JAX reference of the PyTorch forward."""
    avg = jnp.mean(x, axis=(2, 3))                 # (B, C)
    mx = jnp.max(x, axis=(2, 3))                   # (B, C)

    def mlp(v):                                    # v: (B, C)
        h = jnp.maximum(v @ w1.T, 0.0)             # (B, Ch)
        return h @ w2.T                            # (B, C)

    att = jax.nn.sigmoid(mlp(avg) + mlp(mx))       # (B, C)
    return x * att[:, :, None, None]


if __name__ == "__main__":
    # in_channels=32, reduction_ratio=4 -> hidden=8
    B, C, H, W = 2, 32, 16, 16
    reduction_ratio = 4
    Ch = C // reduction_ratio

    key = jax.random.PRNGKey(0)
    kx, k1, k2, kx2, kx3 = jax.random.split(key, 5)

    # Conv2d 1x1 (bias=False) weights, (out, in, 1, 1) squeezed to (out, in).
    w1 = jax.random.normal(k1, (Ch, C), dtype=jnp.float32) * 0.1
    w2 = jax.random.normal(k2, (C, Ch), dtype=jnp.float32) * 0.1

    # 1) Main path: whole-slab single-pass kernel (HW multiple of 128).
    x = jax.random.normal(kx, (B, C, H, W), dtype=jnp.float32)
    out = jax.block_until_ready(channel_attention(x, w1, w2))
    ref = reference(x, w1, w2)
    assert out.shape == (B, C, H, W)
    assert jnp.allclose(out, ref, atol=1e-5, rtol=1e-5), "mismatch (single-pass)"

    # 2) Single-pass with a spatial extent NOT a multiple of 128 (no pad/slice;
    #    full-dim block, Mosaic masks the tail vreg).
    x2 = jax.random.normal(kx2, (B, C, 10, 10), dtype=jnp.float32)
    out2 = jax.block_until_ready(channel_attention(x2, w1, w2))
    assert jnp.allclose(out2, reference(x2, w1, w2), atol=1e-5, rtol=1e-5), \
        "mismatch (single-pass, ragged lanes)"

    # 3) Forced tiny VMEM budget to exercise the spatially tiled two-pass
    #    fallback (pool -> MLP -> apply), incl. the ragged spatial tail mask.
    x3 = jax.random.normal(kx3, (B, C, 20, 20), dtype=jnp.float32)
    out3 = jax.block_until_ready(
        channel_attention(x3, w1, w2, block_budget_bytes=64 * 1024))
    assert jnp.allclose(out3, reference(x3, w1, w2), atol=1e-5, rtol=1e-5), \
        "mismatch (two-pass fallback)"

    print("KERNEL_OK")
</pallas_src>

<mosaic_0001>
module attributes {stable_mosaic.version = 11 : i64} {
  func.func @_channel_attention_kernel(%arg0: i32, %arg1: memref<1x32x256xf32, #tpu.memory_space<vmem>>, %arg2: memref<32x8xf32, #tpu.memory_space<vmem>>, %arg3: memref<8x32xf32, #tpu.memory_space<vmem>>, %arg4: memref<1x32x256xf32, #tpu.memory_space<vmem>>) attributes {dimension_semantics = [#tpu.dimension_semantics<parallel>], iteration_bounds = array<i64: 2>, scalar_prefetch = 0 : i64, scratch_operands = 0 : i64, tpu.core_type = #tpu.core_type<tc>, window_params = [{transform_indices = @transform_0, window_bounds = array<i64: 1, 32, 256>}, {pipeline_mode = #tpu.pipeline_mode<synchronous>, transform_indices = @transform_1, window_bounds = array<i64: 32, 8>}, {pipeline_mode = #tpu.pipeline_mode<synchronous>, transform_indices = @transform_2, window_bounds = array<i64: 8, 32>}, {transform_indices = @transform_3, window_bounds = array<i64: 1, 32, 256>}]} {
    %c0 = arith.constant 0 : index
    %c0_0 = arith.constant 0 : index
    %c0_1 = arith.constant 0 : index
    %0 = vector.load %arg1[%c0, %c0_0, %c0_1] : memref<1x32x256xf32, #tpu.memory_space<vmem>>, vector<1x32x256xf32>
    %cst = arith.constant dense<0.000000e+00> : vector<1x32xf32>
    %1 = vector.multi_reduction <add>, %0, %cst [2] : vector<1x32x256xf32> to vector<1x32xf32>
    %cst_2 = arith.constant 3.906250e-03 : f32
    %2 = vector.broadcast %cst_2 : f32 to vector<1x32xf32>
    %3 = arith.mulf %1, %2 : vector<1x32xf32>
    %cst_3 = arith.constant dense<0xFF800000> : vector<1x32xf32>
    %4 = vector.multi_reduction <maximumf>, %0, %cst_3 [2] : vector<1x32x256xf32> to vector<1x32xf32>
    %5 = tpu.concatenate %3, %4 in 0 : vector<1x32xf32>, vector<1x32xf32> -> vector<2x32xf32>
    %c0_4 = arith.constant 0 : index
    %c0_5 = arith.constant 0 : index
    %6 = vector.load %arg2[%c0_4, %c0_5] : memref<32x8xf32, #tpu.memory_space<vmem>>, vector<32x8xf32>
    %c0_6 = arith.constant 0 : index
    %c0_7 = arith.constant 0 : index
    %7 = vector.load %arg3[%c0_6, %c0_7] : memref<8x32xf32, #tpu.memory_space<vmem>>, vector<8x32xf32>
    %cst_8 = arith.constant dense<0.000000e+00> : vector<2x8xf32>
    %8 = tpu.matmul %5, %6, %cst_8 {dimension_numbers = #tpu.dot_dimension_numbers<[1], [0], [0], [1], [0, 0, 1, 1], [], []>} : vector<2x32xf32>, vector<32x8xf32>, vector<2x8xf32> -> vector<2x8xf32>
    %cst_9 = arith.constant 0.000000e+00 : f32
    %9 = vector.broadcast %cst_9 : f32 to vector<2x8xf32>
    %10 = arith.maximumf %8, %9 : vector<2x8xf32>
    %cst_10 = arith.constant dense<0.000000e+00> : vector<2x32xf32>
    %11 = tpu.matmul %10, %7, %cst_10 {dimension_numbers = #tpu.dot_dimension_numbers<[1], [0], [0], [1], [0, 0, 1, 1], [], []>} : vector<2x8xf32>, vector<8x32xf32>, vector<2x32xf32> -> vector<2x32xf32>
    %12 = vector.extract_strided_slice %11 {offsets = [0, 0], sizes = [1, 32], strides = [1, 1]} : vector<2x32xf32> to vector<1x32xf32>
    %13 = vector.extract_strided_slice %11 {offsets = [1, 0], sizes = [1, 32], strides = [1, 1]} : vector<2x32xf32> to vector<1x32xf32>
    %14 = arith.addf %12, %13 : vector<1x32xf32>
    %15 = arith.negf %14 : vector<1x32xf32>
    %16 = math.exp %15 : vector<1x32xf32>
    %cst_11 = arith.constant 1.000000e+00 : f32
    %17 = vector.broadcast %cst_11 : f32 to vector<1x32xf32>
    %18 = arith.addf %17, %16 : vector<1x32xf32>
    %19 = arith.divf %17, %18 : vector<1x32xf32>
    %20 = vector.shape_cast %19 : vector<1x32xf32> to vector<1x32x1xf32>
    %21 = vector.broadcast %20 : vector<1x32x1xf32> to vector<1x32x256xf32>
    %22 = arith.mulf %0, %21 : vector<1x32x256xf32>
    %c0_12 = arith.constant 0 : index
    %c0_13 = arith.constant 0 : index
    %c0_14 = arith.constant 0 : index
    %23 = vector.load %arg4[%c0_12, %c0_13, %c0_14] : memref<1x32x256xf32, #tpu.memory_space<vmem>>, vector<1x32x256xf32>
    tpu.vector_store %arg4[%c0_12, %c0_13, %c0_14], %22 {strides = array<i32>} : memref<1x32x256xf32, #tpu.memory_space<vmem>>, vector<1x32x256xf32>,
    return
  }
  func.func @transform_0(%arg0: i32) -> (i32, i32, i32) {
    %c0_i32 = arith.constant 0 : i32
    %c0_i32_0 = arith.constant 0 : i32
    %c0_i32_1 = arith.constant 0 : i32
    return %arg0, %c0_i32, %c0_i32_0 : i32, i32, i32
  }
  func.func @transform_1(%arg0: i32) -> (i32, i32) {
    %c0_i32 = arith.constant 0 : i32
    %c0_i32_0 = arith.constant 0 : i32
    %c0_i32_1 = arith.constant 0 : i32
    return %c0_i32, %c0_i32_0 : i32, i32
  }
  func.func @transform_2(%arg0: i32) -> (i32, i32) {
    %c0_i32 = arith.constant 0 : i32
    %c0_i32_0 = arith.constant 0 : i32
    %c0_i32_1 = arith.constant 0 : i32
    return %c0_i32, %c0_i32_0 : i32, i32
  }
  func.func @transform_3(%arg0: i32) -> (i32, i32, i32) {
    %c0_i32 = arith.constant 0 : i32
    %c0_i32_0 = arith.constant 0 : i32
    %c0_i32_1 = arith.constant 0 : i32
    return %arg0, %c0_i32, %c0_i32_0 : i32, i32, i32
  }
}

</mosaic_0001>

<bundles_post_ra>
// kernel: tpu_custom_call.1
= control target key start
LH: loop header
LB: loop body
LE: loop exit
PB: predicated region body
PF: predicated region fallthrough
CT: control target
= control target key end

     0   :  { %8 = vsyncpa [#allocation3], 0  ;;  %s854_s0 = inlined_call_operand.hbm [shape: f32[2,32,256], index: 0, kind: input, shape index: {}]   ;;  %s855_s1 = inlined_call_operand.vmem [shape: f32[32,8], index: 1, kind: input, shape index: {}]   ;;  %s856_s2 = inlined_call_operand.vmem [shape: f32[8,32], index: 2, kind: input, shape index: {}]   ;;  %s857_s3 = inlined_call_operand.hbm [shape: f32[2,32,256], index: 3, kind: output, shape index: {}]  }
   0x1   :  { %10 = vsyncpa [#allocation3 + $0x1], 0 }
   0x2   :  { %11 = vsyncpa [#allocation4], 0 }
   0x3   :  { %13 = vsyncpa [#allocation4 + $0x1], 0  ;;  %s668_s12 = smov 0   ;;  %s670_s13 = smov 0  }
   0x4   :  { %s672_s14 = smov 0   ;;  %s674_s15 = smov 0  }
   0x5 LB: > { %s689_s16 = sadd.s32 4294967295, %s642_s15   ;;  %s468_s17 = sadd.s32 4294967294, %s642_s15   ;;  %s642_s15 = sphi %s674_s15, %s867_s15   ;;  %s638_s14 = sphi %s672_s14, %s866_s14   ;;  %s634_s13 = sphi %s670_s13, %s865_s13   ;;  %s630_s12 = sphi %s668_s12, %s864_s12  }
   0x6   : > { %s693_s18 = sadd.s32 1, %s642_s15   ;;  %s26_s19 = sadd.s32 1, %s638_s14 }
   0x7   : > { %s23_s20 = ssub.s32 %s642_s15, %s693_s18  ;;  %p33_p0 = scmp.ne.s32.totalorder %s638_s14, %s634_s13 }
   0x8   : > { %p24_p1 = scmp.eq.s32.totalorder %s23_s20, 0  ;;  %p34_p2 = scmp.eq.s32.totalorder %s642_s15, 0 }
   0x9   : > { %p39_p3 = scmp.ne.s32.totalorder %s634_s13, %s630_s12  ;;  %p40_p4 = scmp.eq.s32.totalorder %s689_s16, 0 }
   0xa   : > { %s705_s21 = scalar_select %p24_p1, %s638_s14, %s26_s19  }
   0xb   : > { %p707_p5 = por %p34_p2, %p33_p0  ;;  %p711_p6 = por %p40_p4, %p39_p3 }
   0xc   : > { %p105_p7 = scmp.eq.s32.totalorder %s689_s16, 1  ;;  %p111_p8 = scmp.eq.s32.totalorder %s468_s17, 1 }
   0xd   : > { %p499_p10 = scmp.lt.s32.totalorder %s642_s15, 2  ;;  %s137_s26 = sand.u32 1, %s638_s14  }
   0xe   : > { %p718_p11 = por %p105_p7, %p33_p0  ;;  %p722_p12 = por %p111_p8, %p39_p3 }
   0xf   : > { %s485_s27 = sshll.u32 %s642_s15, 6  ;;  %s471_s28 = sshll.u32 %s137_s26, 6 }
  0x10   : > { %s146_s4 = scalar_lea.hbm %s854_s0, %s485_s27  ;;  %s141_s6 = scalar_lea.vmem [#allocation2], %s471_s28 }
  0x11   : > { %s147_s5 = sshll.u32 %s146_s4, 4  ;;  %s149_s7 = sshll.u32 %s141_s6, 4  ;;  %s148_s5 = int_to_ptr.hbm [resolvable:$true] %s147_s5  ;;  %s150_s7 = int_to_ptr.vmem [resolvable:$true] %s149_s7 }
  0x12   : > { %p733_p13 = pnand %p499_p10, %p707_p5  ;;  %p474_p0 = scmp.ge.s32.totalorder %s642_s15, 1 }
  0x13   : > { %p157_p1 = scmp.lt.s32.totalorder %s642_s15, 3  ;;  %s138_s9 = scalar_lea.sflag [#allocation3], %s137_s26 }
  0x14   : > { %s546_s10 = sshra.s32 %s148_s5, 4  ;;  %p550_p3 = pneg %p733_p13  ;;  %s547_s10 = int_to_ptr.hbm [resolvable:$true] %s546_s10 }
  0x15   : > { %s548_s11 = scalar_lea.hbm %s547_s10, 64  ;;  %s553_s20 = scalar_lea.hbm %s854_s0, 128 }
  0x16   : > { %p549_p2 = scmp.ne.s32.totalorder %s547_s10, %s548_s11  ;;  %p554_p5 = scmp.lt.s32.totalorder %s547_s10, %s854_s0 }
  0x17   : > { %p555_p8 = scmp.lt.s32.totalorder %s553_s20, %s548_s11 }
  0x18   : > { %p551_p4 = pnand %p550_p3, %p549_p2 }
  0x19   : > { %p556_p10 = por %p555_p8, %p554_p5 }
  0x1a   : > { %p552_p7 = pneg %p551_p4 }
  0x1c   : > { %p557_p9 = pnand %p556_p10, %p552_p7 }
  0x1e   : > { %560 = shalt.err (!%p557_p9)
}
  0x1f   : > { %s644_s26 = smov 256   ;;  %s645_s28 = smov 16  }
  0x20   : > { %494 = dma.hbm_to_vmem [thread:$0]  (!%p733_p13), %s148_s5, 1024, %s150_s7, %s138_s9, %s644_s26, %s644_s26, %s645_s28  }
  0x21   : > { %p158_p2 = pnand %p474_p0, %p157_p1 }
  0x22   : > { %s754_s29 = sand.u32 (!%p158_p2), 1, %s634_s13  }
  0x23   : > { %161 = sbr.rel (%p158_p2) target bundleno = 593 (0x251), region = 32  ;;  %s475_s30 = sshll.u32 (!%p158_p2), %s754_s29, 6 }
  0x24   : > { %s164_s4 = scalar_lea.sflag (!%p158_p2), [#allocation3], %s754_s29  ;;  %s167_s6 = scalar_lea.vmem (!%p158_p2), [#allocation2], %s475_s30 }
  0x28   : > { %621 = dma.done.wait (%p711_p6), %s164_s4, 1024  }
  0x29   : > { %623 = vsyncadd (%p711_p6), %s164_s4, 4294966272  ;;  %v764_v0 = vld [vmem:[%s167_s6] sm:$0xff]  ;;  %v766_v1 = vld [vmem:[%s167_s6 + $0x8] sm:$0xff]  ;;  %v231_v23 = vlaneseq  ;;  %vm236_vm0 = vcmask 130112   ;;  %vm240_vm1 = vcmask 195712   ;;  %vm244_vm2 = vcmask 261312  }
  0x2a   : > { %v768_v2 = vld [vmem:[%s167_s6 + $0x20] sm:$0xff]  ;;  %v215_v3 = vmax.f32 %v764_v0, %v766_v1  ;;  %v199_v4 = vadd.f32 %v766_v1, %v764_v0  ;;  %v774_v5 = vld [vmem:[%s167_s6 + $0x28] sm:$0xff]  ;;  %v778_v7 = vld [vmem:[%s167_s6 + $0x10] sm:$0xff]  ;;  %vm259_vm3 = vcmask 1040384   ;;  %vm266_vm4 = vcmask 261120   ;;  %s190_s22 = scalar_lea.vmem [#allocation5], %s475_s30 }
  0x2b   : > { %v205_v6 = vadd.f32 %v774_v5, %v768_v2  ;;  %v780_v8 = vld [vmem:[%s167_s6 + $0x18] sm:$0xff]  ;;  %v782_v9 = vld [vmem:[%s167_s6 + $0x30] sm:$0xff]  ;;  %v221_v14 = vmax.f32 %v768_v2, %v774_v5  ;;  %v262_v18 = vld [vmem:[%s855_s1 + $0x8] sm:$0xff]  ;;  %v232_v24 = vand.u32 127, %v231_v23  ;;  %vm291_vm5 = vcmask 64512   ;;  %s486_s27 = sshll.u32 %s689_s16, 6 }
  0x2c   : > { %216 = vmax.xlane.f32.xlu2 %v215_v3  ;;  %200 = vadd.xlane.f32.xlu0 %v199_v4  ;;  %v784_v10 = vld [vmem:[%s167_s6 + $0x38] sm:$0xff]  ;;  %v218_v11 = vmax.f32 %v778_v7, %v780_v8  ;;  %v202_v12 = vadd.f32 %v780_v8, %v778_v7  ;;  %v263_v17 = vld [vmem:[%s855_s1 + $0x10] sm:$0xff]  ;;  %v261_v19 = vld [vmem:[%s855_s1] sm:$0xff]  ;;  %v340_v55 = vshrl.u32 %v231_v23, 7  ;;  %s391_s4 = scalar_lea.hbm %s857_s3, %s486_s27  ;;  %s392_s6 = sshll.u32 %s190_s22, 4  ;;  %s393_s6 = int_to_ptr.vmem [resolvable:$true] %s392_s6 }
  0x2d   : > { %206 = vadd.xlane.f32.xlu1 %v205_v6  ;;  %v208_v13 = vadd.f32 %v784_v10, %v782_v9  ;;  %v224_v15 = vmax.f32 %v782_v9, %v784_v10  ;;  %v264_v16 = vld [vmem:[%s855_s1 + $0x18] sm:$0xff]  ;;  %v234_v27 = vadd.s32 4294967288, %v232_v24  ;;  %v238_v30 = vadd.s32 4294967280, %v232_v24  ;;  %v265_v52 = vld [vmem:[%s856_s2] sm:$0xff]  ;;  %s394_s23 = sshll.u32 %s391_s4, 4  ;;  %s380_s16 = scalar_lea.sflag [#allocation4], %s754_s29  ;;  %s395_s23 = int_to_ptr.hbm [resolvable:$true] %s394_s23 }
  0x2e   : > { %282 = vmatpush.msra.mxu0 %v264_v16  ;;  %v242_v35 = vadd.s32 4294967272, %v232_v24  ;;  %310 = vmatpush.msra.mxu1 %v265_v52  ;;  %v353_v56 = vadd.s32 16, %v340_v55  ;;  %v347_v57 = vadd.s32 8, %v340_v55  ;;  %s590_s30 = sshra.s32 %s395_s23, 4  ;;  %s596_s9 = scalar_lea.hbm %s857_s3, 128  ;;  %s591_s30 = int_to_ptr.hbm [resolvable:$true] %s590_s30 }
  0x2f   : > { %537 = vset.pattern.permute.xlu2 %v340_v55  ;;  %s592_s5 = scalar_lea.hbm %s591_s30, 64  ;;  %p597_p0 = scmp.lt.s32.totalorder %s591_s30, %s857_s3 }
  0x30   : > { %283 = vmatpush.msra.mxu0 %v263_v17  ;;  %539 = vset.pattern.permute.xlu1 %v353_v56  ;;  %p593_p6 = scmp.ne.s32.totalorder %s591_s30, %s592_s5  ;;  %p598_p1 = scmp.lt.s32.totalorder %s596_s9, %s592_s5 }
  0x31   : > { %538 = vset.pattern.permute.xlu0 %v347_v57 }
  0x32   : > { %284 = vmatpush.msra.mxu0 %v262_v18  ;;  %p594_p9 = pnand %p593_p6, %p718_p11  ;;  %p599_p3 = por %p598_p1, %p597_p0 }
  0x34   : > { %219 = vmax.xlane.f32.xlu2 %v218_v11  ;;  %203 = vadd.xlane.f32.xlu0 %v202_v12  ;;  %p595_p13 = pneg %p594_p9 }
  0x35   : > { %209 = vadd.xlane.f32.xlu1 %v208_v13  ;;  %285 = vmatpush.msra.mxu0 %v261_v19  ;;  %v359_v19 = vadd.s32 24, %v340_v55 }
  0x36   : > { %p600_p4 = pnand %p599_p3, %p595_p13 }
  0x3c   : > { %222 = vmax.xlane.f32.xlu0 %v221_v14 }
  0x3d   : > { %225 = vmax.xlane.f32.xlu1 %v224_v15 }
  0x9f   : > { %v201_v20 = vpop.xlane.xlu0 %200  ;;  %v217_v21 = vpop.xlane.xlu2 %216 }
  0xa0   : > { %v207_v22 = vpop.xlane.xlu1 %206  ;;  %v211_v25 = vmul.f32 0.00390625, %v201_v20  ;;  %v251_v37 = vperm.slane %v217_v21, %v232_v24 }
  0xa1   : > { %v213_v31 = vmul.f32 0.00390625, %v207_v22 }
  0xa2   : > { %v233_v34 = vperm.slane %v211_v25, %v232_v24 }
  0xa3   : > { %v239_v40 = vperm.slane %v213_v31, %v238_v30 }
  0xa7   : > { %v204_v26 = vpop.xlane.xlu0 %203  ;;  %v220_v32 = vpop.xlane.xlu2 %219 }
  0xa8   : > { %v212_v28 = vmul.f32 0.00390625, %v204_v26  ;;  %v210_v29 = vpop.xlane.xlu1 %209  ;;  %v252_v38 = vperm.slane %v220_v32, %v234_v27 }
  0xa9   : > { %v214_v36 = vmul.f32 0.00390625, %v210_v29 }
  0xaa   : > { %v235_v33 = vperm.slane %v212_v28, %v234_v27  ;;  %v253_v46 = vsel %vm236_vm0, %v252_v38, %v251_v37 }
  0xab   : > { %v243_v41 = vperm.slane %v214_v36, %v242_v35 }
  0xac   : > { %v237_v39 = vsel %vm236_vm0, %v235_v33, %v233_v34 }
  0xad   : > { %v241_v45 = vsel %vm240_vm1, %v239_v40, %v237_v39 }
  0xae   : > { %v245_v49 = vsel %vm244_vm2, %v243_v41, %v241_v45 }
  0xaf   : > { %v223_v42 = vpop.xlane.xlu0 %222 }
  0xb0   : > { %v254_v43 = vperm.slane %v223_v42, %v238_v30  ;;  %v226_v44 = vpop.xlane.xlu1 %225 }
  0xb1   : > { %v256_v47 = vperm.slane %v226_v44, %v242_v35 }
  0xb2   : > { %v255_v48 = vsel %vm240_vm1, %v254_v43, %v253_v46 }
  0xb3   : > { %v257_v50 = vsel %vm244_vm2, %v256_v47, %v255_v48 }
  0xb4   : > { %v260_v51 = vsel %vm259_vm3, %v245_v49, %v257_v50 }
  0xb5   : > { %477 = vmatmul.msk.f32.vlgmr.msra.gmra.mxu0 %vm266_vm4, %v260_v51 }
 0x132   : > { %v287_v53 = vpop.f32.mrf.mxu0 }
 0x133   : > { %v290_v54 = vmax.f32 %v287_v53, 0.0 }
 0x135   : > { %478 = vmatmul.msk.f32.vlgmr.msra.gmra.mxu1 %vm291_vm5, %v290_v54 }
 0x1b2   : > { %v312_v58 = vpop.f32.mrf.mxu1 }
 0x1b3   : > { %v316_v59 = vrot.slane %v312_v58, 1 }
 0x1b5   : > { %v318_v60 = vadd.f32 %v316_v59, %v312_v58 }
 0x1b7   : > { %v479_v61 = vmul.f32 -1.442695, %v318_v60 }
 0x1b9   : > { %542 = vpow2.f32 %v479_v61 }
 0x1bf   : > { %v543_v62 = vpop.eup %542 }
 0x1c0   : > { %v322_v63 = vadd.f32 1.0, %v543_v62 }
 0x1c2   : > { %544 = vrcp.f32 %v322_v63  ;;  %v334_v11 = vand.u32 2147483648, %v322_v63  ;;  %v332_v13 = vand.u32 2147483647, %v322_v63  ;;  %vm328_vm7 = vweird.f32 %v322_v63 }
 0x1c4   : > { %v335_v15 = vor.u32 1.1754944e-38, %v334_v11  ;;  %vm333_vm9 = vcmp.eq.f32.partialorder %v332_v13, 8.507059e+37 }
 0x1c8   : > { %v545_v3 = vpop.eup %544 }
 0x1c9   : > { %v324_v4 = vmul.f32 %v545_v3, %v322_v63  ;;  %vm329_vm6 = vweird.f32 %v545_v3 }
 0x1ca   : > { %vm330_vm8 = vmor %vm328_vm7, %vm329_vm6 }
 0x1cb   : > { %v325_v6 = vsub.f32 1.0, %v324_v4 }
 0x1cd   : > { %v326_v12 = vmul.f32 %v545_v3, %v325_v6 }
 0x1cf   : > { %v327_v14 = vadd.f32 %v545_v3, %v326_v12 }
 0x1d1   : > { %v331_v16 = vsel %vm330_vm8, %v545_v3, %v327_v14 }
 0x1d2   : > { %v336_v17 = vsel %vm333_vm9, %v335_v15, %v331_v16 }
 0x1d3   : > { %v338_v18 = vperm.slane %v336_v17, 0 }
 0x1d5   : > { %355 = vperm.xlu1 %539, %v338_v18   ;;  %349 = vperm.xlu0 %538, %v338_v18  }
 0x1d6   : > { %343 = vperm.xlu2 %537, %v338_v18  }
 0x1dd   : > { %541 = vset.pattern.permute.xlu0 %v359_v19 }
 0x1de   : > { %540 = vset.pattern.permute.xlu2 %v359_v19 }
 0x1e6   : > { %361 = vperm.xlu2 %540, %v338_v18  }
 0x230   : > { %v344_v20 = vpop.permute.xlu2 %343 }
 0x231   : > { %v363_v21 = vmul.f32 %v344_v20, %v764_v0  ;;  %v364_v22 = vmul.f32 %v344_v20, %v766_v1 }
 0x233   : > { %371 = vst [vmem:[%s190_s22] sm:$0xff] %v363_v21 }
 0x234   : > { %372 = vst [vmem:[%s190_s22 + $0x8] sm:$0xff] %v364_v22 }
 0x240   : > { %v362_v23 = vpop.permute.xlu2 %361 }
 0x241   : > { %v369_v24 = vmul.f32 %v362_v23, %v782_v9  ;;  %v370_v25 = vmul.f32 %v362_v23, %v784_v10 }
 0x243   : > { %377 = vst [vmem:[%s190_s22 + $0x30] sm:$0xff] %v369_v24 }
 0x244   : > { %378 = vst [vmem:[%s190_s22 + $0x38] sm:$0xff] %v370_v25 }
 0x247   : > { %v356_v0 = vpop.permute.xlu1 %355  ;;  %v350_v1 = vpop.permute.xlu0 %349 }
 0x248   : > { %v367_v26 = vmul.f32 %v356_v0, %v768_v2  ;;  %v368_v27 = vmul.f32 %v356_v0, %v774_v5  ;;  %v365_v9 = vmul.f32 %v350_v1, %v778_v7  ;;  %v366_v10 = vmul.f32 %v350_v1, %v780_v8 }
 0x24a   : > { %375 = vst [vmem:[%s190_s22 + $0x20] sm:$0xff] %v367_v26 }
 0x24b   : > { %376 = vst [vmem:[%s190_s22 + $0x28] sm:$0xff] %v368_v27 }
 0x24c   : > { %373 = vst [vmem:[%s190_s22 + $0x10] sm:$0xff] %v365_v9 }
 0x24d   : > { %374 = vst [vmem:[%s190_s22 + $0x18] sm:$0xff] %v366_v10 }
 0x24e   : > { %603 = shalt.err (!%p600_p4)
}
 0x24f   : > { %s646_s29 = smov 256   ;;  %s647_s17 = smov 16  }
 0x250   : > { %489 = dma.vmem_to_hbm [thread:$0]  (%p718_p11), %s393_s6, 1024, %s395_s23, %s380_s16, %s646_s29, %s646_s29, %s647_s17  }
 0x251 PF: > { %s409_s19 = sand.u32 1, %s630_s12   ;;  %p863_p7 = scmp.ge.s32.totalorder %s642_s15, 2 }
 0x252   : > { %s410_s20 = scalar_lea.sflag [#allocation4], %s409_s19 }
 0x253   : > { %p496_p5 = pnand %p863_p7, %p722_p12 }
 0x255   : > { %p497_p8 = pneg %p496_p5 }
 0x257   : > { %625 = dma.done.wait (%p497_p8), %s410_s20, 1024  }
 0x258   : > { %627 = vsyncadd (%p497_p8), %s410_s20, 4294966272  ;;  %p16_p10 = scmp.ge.s32.totalorder %s693_s18, 4   ;;  %s864_s12 = smov %s634_s13 }
 0x259   : > { %s865_s13 = smov %s638_s14  ;;  %s866_s14 = smov %s705_s21 }
 0x25a   : > { %s867_s15 = smov %s693_s18  ;;  %18 = sbr.rel (!%p16_p10) target bundleno = 5 (0x5), region = 77 }
 0x25f   :  { %416 = vsyncpa [#allocation3], 1 }
 0x260   :  { %418 = vsyncpa [#allocation3 + $0x1], 1 }
 0x261   :  { %419 = vsyncpa [#allocation4], 1 }
 0x262   :  { %421 = vsyncpa [#allocation4 + $0x1], 1 }

</bundles_post_ra>
